<compile_context>
chip_gen: v5e
topology: v5e:2x2
jax: 0.10.0
libtpu: 0.0.40
codegen_flags: <defaults>
</compile_context>

<pallas_src>
import functools
import math

import jax
import jax.numpy as jnp
from jax.experimental import pallas as pl
from jax.experimental.pallas import tpu as pltpu

_LN10 = math.log(10.0)
_HALF_LOG_2PI = 0.5 * math.log(2.0 * math.pi)


def _round_up(x, k):
    return ((x + k - 1) // k) * k


@functools.lru_cache(maxsize=None)
def _vmem_plan():
    """Generation-aware (vmem_limit_bytes, per-buffer y_pred tile budget)."""
    cap = 64 * 1024 * 1024  # conservative default = v7x physical VMEM per TC
    try:
        cap = int(pltpu.get_tpu_info().vmem_capacity_bytes)
    except Exception:
        pass
    # v7x (64 MiB): limit 48 MiB, tile budget 12 MiB.
    # v5e/v6e (128 MiB): limit 96 MiB, tile budget 24 MiB.
    vmem_limit = min((3 * cap) // 4, 96 * 1024 * 1024)
    tile_budget = vmem_limit // 4  # y_pred is double-buffered; leave headroom
    return vmem_limit, tile_budget


def _gws_kernel(y_pred_ref, y_obs_ref, log_sigma_ref, out_ref, *,
                n_obs, m_total, block_m, mask_m):
    # VMEM tiles:
    #   y_pred_ref    : (TN, TM)   native dtype, upcast here
    #   y_obs_ref     : (1,  TM)
    #   log_sigma_ref : (1,  TN)   lane-dense
    #   out_ref       : (1,  TN)   lane-dense f32; doubles as the accumulator
    j = pl.program_id(1)

    @pl.when(j == 0)
    def _init():
        out_ref[...] = jnp.zeros_like(out_ref)

    r = (y_pred_ref[...].astype(jnp.float32)
         - y_obs_ref[...].astype(jnp.float32))                        # (TN, TM)
    if mask_m:
        # Last M-tile may read past M: zero the out-of-range lanes so they
        # cannot leak into the row sums of valid rows.
        lane = jax.lax.broadcasted_iota(jnp.int32, r.shape, 1)
        r = jnp.where(j * block_m + lane < m_total, r, jnp.float32(0.0))

    log_sigma = log_sigma_ref[...].astype(jnp.float32)                # (1, TN)
    # 1/sigma^2 = exp(-2*ln(10)*log_sigma)  (one EUP exp per tile — free slot)
    inv_sigma2 = jnp.exp(jnp.float32(-2.0 * _LN10) * log_sigma)       # (1, TN)

    ssq = jnp.sum(r * r, axis=-1, keepdims=True)                      # (TN, 1)
    # Column -> lane-dense row (XLU transpose; XLU is idle in this kernel).
    out_ref[...] += jnp.transpose(ssq) * inv_sigma2                   # (1, TN)

    @pl.when(j == pl.num_programs(1) - 1)
    def _finalize():
        # log(sqrt(2*pi)*sigma) = ln(10)*log_sigma + 0.5*ln(2*pi)
        log_norm = (jnp.float32(_LN10) * log_sigma
                    + jnp.float32(_HALF_LOG_2PI))
        out_ref[...] = (jnp.float32(-0.5) * out_ref[...]
                        - jnp.float32(n_obs) * log_norm)


@functools.partial(jax.jit, static_argnames=("block_n", "block_m"))
def gaussian_with_scatter(y_pred, y_obs, log_sigma, *, block_n=None, block_m=None):
    """Pallas implementation of GaussianWithScatter.forward.

    y_pred    : (N, M) float (any float dtype; streamed natively)
    y_obs     : (M,)   float
    log_sigma : (N, 1) float (base-10 log of intrinsic scatter)
    returns   : (N,)   float32
    """
    # TODO(synk): for the literal OptimizerWrapper case (N == 1, small M) a
    #             plain XLA fusion is cheaper; batch samples before calling.
    n, m = y_pred.shape
    itemsize = y_pred.dtype.itemsize
    vmem_limit, tile_budget = _vmem_plan()

    m_phys = _round_up(m, 128)           # lanes physically occupied per row
    rows_ref = max(8, min(n, 128))

    # ---- M tiling: only tile when a full-M tile of `rows_ref` rows would
    # blow the per-buffer budget (keeps v7x's 64 MiB VMEM safe for huge M).
    if block_m is None:
        if tile_budget // (m_phys * itemsize) >= rows_ref:
            block_m = m                                   # single reduction step
        else:
            block_m = max(128,
                          (tile_budget // (rows_ref * itemsize)) // 128 * 128)
            if block_m >= m:
                block_m = m

    # ---- N tiling: biggest tile the budget allows, but keep >= 2 blocks so
    # the "parallel" axis can shard across v7x's two TensorCores.
    if block_n is None:
        if n <= 256:
            block_n = n                                   # full extent is legal
        else:
            bm_phys = m_phys if block_m == m else block_m
            budget_rows = max(128,
                              (tile_budget // (bm_phys * itemsize)) // 128 * 128)
            half_rows = _round_up((n + 1) // 2, 128)
            block_n = max(128, min(budget_rows, half_rows))

    n_blocks = -(-n // block_n)
    m_blocks = -(-m // block_m)
    mask_m = (block_m < m) and (m % block_m != 0)

    kernel = functools.partial(_gws_kernel, n_obs=m, m_total=m,
                               block_m=block_m, mask_m=mask_m)

    y_obs2 = y_obs.reshape(1, m)
    log_sigma2 = log_sigma.reshape(1, n)   # (N,1) -> (1,N): contiguous relabel

    out = pl.pallas_call(
        kernel,
        out_shape=jax.ShapeDtypeStruct((1, n), jnp.float32),
        grid_spec=pltpu.PrefetchScalarGridSpec(
            num_scalar_prefetch=0,
            grid=(n_blocks, m_blocks),                    # reduction axis last
            in_specs=[
                pl.BlockSpec((block_n, block_m), lambda i, j: (i, j)),  # y_pred
                pl.BlockSpec((1, block_m), lambda i, j: (0, j)),        # y_obs
                pl.BlockSpec((1, block_n), lambda i, j: (0, i)),        # log_sigma
            ],
            out_specs=pl.BlockSpec((1, block_n), lambda i, j: (0, i)),
        ),
        compiler_params=pltpu.CompilerParams(
            dimension_semantics=("parallel", "arbitrary"),
            vmem_limit_bytes=vmem_limit,
        ),
    )(y_pred, y_obs2, log_sigma2)

    return out.reshape(n)


def _reference(y_pred, y_obs, log_sigma):
    sigma = 10.0 ** log_sigma                       # (N, 1)
    delta = (y_pred - y_obs[None, :]) / sigma       # (N, M)
    return (jnp.sum(-0.5 * delta * delta, axis=-1)
            - y_obs.shape[0] * jnp.ravel(jnp.log(jnp.sqrt(2.0 * jnp.pi) * sigma)))


if __name__ == "__main__":
    key = jax.random.PRNGKey(0)
    k1, k2, k3 = jax.random.split(key, 3)

    N, M = 8, 16  # batch of parameter samples, number of observational data

    # Deterministic synthetic "buffer" and inputs (no checkpoint load).
    y_obs = jax.random.normal(k1, (M,), dtype=jnp.float32)
    y_pred = y_obs[None, :] + 0.1 * jax.random.normal(k2, (N, M), dtype=jnp.float32)
    log_sigma = jax.random.uniform(
        k3, (N, 1), dtype=jnp.float32, minval=-2.0, maxval=0.0)

    out = jax.block_until_ready(gaussian_with_scatter(y_pred, y_obs, log_sigma))
    ref = _reference(y_pred, y_obs, log_sigma)
    assert out.shape == (N,)
    assert jnp.allclose(out, ref, rtol=1e-5, atol=1e-5), (out, ref)

    # OptimizerWrapper.forward() returns a scalar: log_post evaluated at a
    # single parameter sample (N == 1 row of the batched kernel).
    scalar = jax.block_until_ready(
        gaussian_with_scatter(y_pred[:1], y_obs, log_sigma[:1]))[0]
    assert jnp.allclose(scalar, ref[0], rtol=1e-5, atol=1e-5)

    # Exercise the tiled path: partial N/M blocks, in-kernel M-tail mask, and
    # multi-step reduction accumulating directly into out_ref.
    N2, M2 = 300, 200
    kk1, kk2, kk3 = jax.random.split(jax.random.PRNGKey(1), 3)
    y_obs2 = jax.random.normal(kk1, (M2,), dtype=jnp.float32)
    y_pred2 = y_obs2[None, :] + 0.1 * jax.random.normal(
        kk2, (N2, M2), dtype=jnp.float32)
    log_sigma2 = jax.random.uniform(
        kk3, (N2, 1), dtype=jnp.float32, minval=-2.0, maxval=0.0)
    out2 = jax.block_until_ready(
        gaussian_with_scatter(y_pred2, y_obs2, log_sigma2,
                              block_n=128, block_m=128))
    ref2 = _reference(y_pred2, y_obs2, log_sigma2)
    assert out2.shape == (N2,)
    assert jnp.allclose(out2, ref2, rtol=5e-5, atol=1e-3), (out2, ref2)

    print("KERNEL_OK")
</pallas_src>

<mosaic_0001>
module attributes {stable_mosaic.version = 11 : i64} {
  func.func @_gws_kernel(%arg0: i32, %arg1: i32, %arg2: memref<8x16xf32, #tpu.memory_space<vmem>>, %arg3: memref<1x16xf32, #tpu.memory_space<vmem>>, %arg4: memref<1x8xf32, #tpu.memory_space<vmem>>, %arg5: memref<1x8xf32, #tpu.memory_space<vmem>>) attributes {dimension_semantics = [#tpu.dimension_semantics<parallel>, #tpu.dimension_semantics<arbitrary>], iteration_bounds = array<i64: 1, 1>, scalar_prefetch = 0 : i64, scratch_operands = 0 : i64, tpu.core_type = #tpu.core_type<tc>, window_params = [{transform_indices = @transform_0, window_bounds = array<i64: 8, 16>}, {transform_indices = @transform_1, window_bounds = array<i64: 1, 16>}, {transform_indices = @transform_2, window_bounds = array<i64: 1, 8>}, {transform_indices = @transform_3, window_bounds = array<i64: 1, 8>}]} {
    %c0_i32 = arith.constant 0 : i32
    %0 = arith.cmpi eq, %arg1, %c0_i32 : i32
    %1 = arith.extui %0 : i1 to i32
    %c0_i32_0 = arith.constant 0 : i32
    %2 = arith.cmpi ne, %1, %c0_i32_0 : i32
    scf.if %2 {
      %cst_13 = arith.constant 0.000000e+00 : f32
      %22 = vector.broadcast %cst_13 : f32 to vector<1x8xf32>
      %c0_14 = arith.constant 0 : index
      %c0_15 = arith.constant 0 : index
      %23 = vector.load %arg5[%c0_14, %c0_15] : memref<1x8xf32, #tpu.memory_space<vmem>>, vector<1x8xf32>
      tpu.vector_store %arg5[%c0_14, %c0_15], %22 {strides = array<i32>} : memref<1x8xf32, #tpu.memory_space<vmem>>, vector<1x8xf32>,
    } else {
    }
    %c0 = arith.constant 0 : index
    %c0_1 = arith.constant 0 : index
    %3 = vector.load %arg2[%c0, %c0_1] : memref<8x16xf32, #tpu.memory_space<vmem>>, vector<8x16xf32>
    %c0_2 = arith.constant 0 : index
    %c0_3 = arith.constant 0 : index
    %4 = vector.load %arg3[%c0_2, %c0_3] : memref<1x16xf32, #tpu.memory_space<vmem>>, vector<1x16xf32>
    %5 = vector.broadcast %4 : vector<1x16xf32> to vector<8x16xf32>
    %6 = arith.subf %3, %5 : vector<8x16xf32>
    %c0_4 = arith.constant 0 : index
    %c0_5 = arith.constant 0 : index
    %7 = vector.load %arg4[%c0_4, %c0_5] : memref<1x8xf32, #tpu.memory_space<vmem>>, vector<1x8xf32>
    %cst = arith.constant -4.60517025 : f32
    %8 = vector.broadcast %cst : f32 to vector<1x8xf32>
    %9 = arith.mulf %8, %7 : vector<1x8xf32>
    %10 = math.exp %9 : vector<1x8xf32>
    %11 = arith.mulf %6, %6 : vector<8x16xf32>
    %cst_6 = arith.constant dense<0.000000e+00> : vector<8xf32>
    %12 = vector.multi_reduction <add>, %11, %cst_6 [1] : vector<8x16xf32> to vector<8xf32>
    %13 = vector.shape_cast %12 : vector<8xf32> to vector<8x1xf32>
    %c0_7 = arith.constant 0 : index
    %c0_8 = arith.constant 0 : index
    %14 = vector.load %arg5[%c0_7, %c0_8] : memref<1x8xf32, #tpu.memory_space<vmem>>, vector<1x8xf32>
    %15 = tpu.transpose %13, [1, 0] : vector<8x1xf32> -> vector<1x8xf32>
    %16 = arith.mulf %15, %10 : vector<1x8xf32>
    %17 = arith.addf %14, %16 : vector<1x8xf32>
    %c0_9 = arith.constant 0 : index
    %c0_10 = arith.constant 0 : index
    %18 = vector.load %arg5[%c0_9, %c0_10] : memref<1x8xf32, #tpu.memory_space<vmem>>, vector<1x8xf32>
    tpu.vector_store %arg5[%c0_9, %c0_10], %17 {strides = array<i32>} : memref<1x8xf32, #tpu.memory_space<vmem>>, vector<1x8xf32>,
    %c0_i32_11 = arith.constant 0 : i32
    %19 = arith.cmpi eq, %arg1, %c0_i32_11 : i32
    %20 = arith.extui %19 : i1 to i32
    %c0_i32_12 = arith.constant 0 : i32
    %21 = arith.cmpi ne, %20, %c0_i32_12 : i32
    scf.if %21 {
      %cst_13 = arith.constant 2.30258512 : f32
      %22 = vector.broadcast %cst_13 : f32 to vector<1x8xf32>
      %23 = arith.mulf %22, %7 : vector<1x8xf32>
      %cst_14 = arith.constant 0.918938517 : f32
      %24 = vector.broadcast %cst_14 : f32 to vector<1x8xf32>
      %25 = arith.addf %23, %24 : vector<1x8xf32>
      %c0_15 = arith.constant 0 : index
      %c0_16 = arith.constant 0 : index
      %26 = vector.load %arg5[%c0_15, %c0_16] : memref<1x8xf32, #tpu.memory_space<vmem>>, vector<1x8xf32>
      %cst_17 = arith.constant -5.000000e-01 : f32
      %27 = vector.broadcast %cst_17 : f32 to vector<1x8xf32>
      %28 = arith.mulf %27, %26 : vector<1x8xf32>
      %cst_18 = arith.constant 1.600000e+01 : f32
      %29 = vector.broadcast %cst_18 : f32 to vector<1x8xf32>
      %30 = arith.mulf %29, %25 : vector<1x8xf32>
      %31 = arith.subf %28, %30 : vector<1x8xf32>
      %c0_19 = arith.constant 0 : index
      %c0_20 = arith.constant 0 : index
      %32 = vector.load %arg5[%c0_19, %c0_20] : memref<1x8xf32, #tpu.memory_space<vmem>>, vector<1x8xf32>
      tpu.vector_store %arg5[%c0_19, %c0_20], %31 {strides = array<i32>} : memref<1x8xf32, #tpu.memory_space<vmem>>, vector<1x8xf32>,
    } else {
    }
    return
  }
  func.func @transform_0(%arg0: i32, %arg1: i32) -> (i32, i32) {
    %c0_i32 = arith.constant 0 : i32
    return %arg0, %arg1 : i32, i32
  }
  func.func @transform_1(%arg0: i32, %arg1: i32) -> (i32, i32) {
    %c0_i32 = arith.constant 0 : i32
    %c0_i32_0 = arith.constant 0 : i32
    return %c0_i32, %arg1 : i32, i32
  }
  func.func @transform_2(%arg0: i32, %arg1: i32) -> (i32, i32) {
    %c0_i32 = arith.constant 0 : i32
    %c0_i32_0 = arith.constant 0 : i32
    return %c0_i32, %arg0 : i32, i32
  }
  func.func @transform_3(%arg0: i32, %arg1: i32) -> (i32, i32) {
    %c0_i32 = arith.constant 0 : i32
    %c0_i32_0 = arith.constant 0 : i32
    return %c0_i32, %arg0 : i32, i32
  }
}

</mosaic_0001>

<bundles_post_ra>
// kernel: gaussian_with_scatter.1
= control target key start
LH: loop header
LB: loop body
LE: loop exit
PB: predicated region body
PF: predicated region fallthrough
CT: control target
= control target key end

     0   :  { %8 = vsyncpa [#allocation3], 0  ;;  %s210_s0 = inlined_call_operand.hbm [shape: f32[8,16], index: 0, kind: input, shape index: {}]   ;;  %s211_s1 = inlined_call_operand.vmem [shape: f32[1,16], index: 1, kind: input, shape index: {}]   ;;  %s212_s2 = inlined_call_operand.vmem [shape: f32[1,8], index: 2, kind: input, shape index: {}]   ;;  %s213_s3 = inlined_call_operand.hbm [shape: f32[1,8], index: 3, kind: output, shape index: {}]  }
   0x1   :  { %9 = vsyncpa [#allocation4], 0  ;;  %s15_s14 = sshll.u32 %s210_s0, 4  ;;  %s172_s15 = smov [#allocation2]   ;;  %s16_s14 = int_to_ptr.hbm [resolvable:$true] %s15_s14 }
   0x2   :  { %s17_s16 = sshll.u32 %s172_s15, 4  ;;  %s18_s16 = int_to_ptr.vmem [resolvable:$true] %s17_s16 }
   0x3   :  { %20 = dma.hbm_to_vmem [thread:$0]  %s16_s14, 128, %s18_s16, [#allocation3]  }
   0x4   :  { %168 = dma.done.wait [#allocation3], 128  }
   0x5   :  { %169 = vsyncadd [#allocation3], 4294967168  ;;  %v35_v0 = vld [vmem:[#allocation2] sm:$0xff]  ;;  %vm46_vm0 = vcmask 130048   ;;  %vm33_vm1 = vcmask 57344   ;;  %v173_v5 = vmov 0.0  }
   0x6   :  { %v117_v1 = vld [vmem:[%s211_s1] ss:$0 sm:$0xff]  ;;  %34 = vst.msk [vmem:[#allocation5] sm:$0x1] %vm33_vm1, %v173_v5  ;;  %s174_s1 = smov [#allocation5]  }
   0x7   :  { %v40_v2 = vsub.f32 %v35_v0, %v117_v1  ;;  %v41_v7 = vld [vmem:[%s212_s2] sm:$0x1]  ;;  %s102_s20 = sshll.u32 %s174_s1, 4  ;;  %s104_s2 = sshll.u32 %s213_s3, 4  ;;  %s103_s20 = int_to_ptr.vmem [resolvable:$true] %s102_s20  ;;  %s105_s2 = int_to_ptr.hbm [resolvable:$true] %s104_s2 }
   0x8   :  { %v42_v8 = vmul.f32 -4.6051702, %v41_v7  ;;  %v90_v14 = vmul.f32 2.3025851, %v41_v7 }
   0x9   :  { %v45_v3 = vmul.f32 %v40_v2, %v40_v2 }
   0xa   :  { %v43_v9 = vmul.f32 1.442695, %v42_v8  ;;  %v91_v16 = vadd.f32 0.9189385, %v90_v14 }
   0xb   :  { %v47_v4 = vsel %vm46_vm0, %v45_v3, 0.0 }
   0xc   :  { %48 = vadd.xlane.f32.xlu0 %v47_v4  ;;  %118 = vpow2.f32 %v43_v9  ;;  %v94_v17 = vmul.f32 16.0, %v91_v16 }
   0xd   :  { %v50_v12 = vld [vmem:[#allocation5] sm:$0x1] }
  0x12   :  { %v119_v10 = vpop.eup %118 }
  0x7f   :  { %v49_v6 = vpop.xlane.xlu0 %48 }
  0x80   :  { %51 = vxpose.xlu0.b32.start.end [1/1] (short) (narrow) %v49_v6, 8 }
 0x124   :  { %v67_v11 = vpop.trf.xlu0 }
 0x125   :  { %v83_v13 = vmul.f32 %v119_v10, %v67_v11 }
 0x127   :  { %v84_v15 = vadd.f32 %v83_v13, %v50_v12 }
 0x129   :  { %86 = vst.msk [vmem:[#allocation5] sm:$0x1] %vm33_vm1, %v84_v15 }
 0x130   :  { %v92_v18 = vld [vmem:[#allocation5] sm:$0x1] }
 0x131   :  { %v93_v19 = vmul.f32 -0.5, %v92_v18 }
 0x133   :  { %v95_v20 = vsub.f32 %v93_v19, %v94_v17 }
 0x135   :  { %96 = vst.msk [vmem:[#allocation5] sm:$0x1] %vm33_vm1, %v95_v20 }
 0x136   :  { %107 = dma.vmem_to_hbm [thread:$0]  %s103_s20, 16, %s105_s2, [#allocation4]  }
 0x137   :  { %170 = dma.done.wait [#allocation4], 16  }
 0x138   :  { %171 = vsyncadd [#allocation4], 4294967280 }
 0x139   :  { %112 = vsyncpa [#allocation3], 1 }
 0x13a   :  { %113 = vsyncpa [#allocation4], 1 }

</bundles_post_ra>
